<compile_context>
chip_gen: v7x
topology: tpu7x:2x2x1
jax: 0.10.0
libtpu: 0.0.40
codegen_flags: <defaults>
</compile_context>

<pallas_src>
import numpy as np
import jax
import jax.numpy as jnp
from jax.experimental import pallas as pl
from jax.experimental.pallas import tpu as pltpu  # noqa: F401  (TPU backend)

# ---------------- config (small, consistent with the module) ----------------
RESOLUTION = (16, 16)
HID = 32          # hidden_size
BATCH = 2
LANE = 128        # TPU lane width


# ------------------------------ grid constant -------------------------------
def build_grid(resolution):
    """Identical to the PyTorch build_grid: (1, H, W, 4)."""
    ranges = [np.linspace(0.0, 1.0, num=r) for r in resolution]
    grid = np.meshgrid(*ranges, sparse=False, indexing='ij')
    grid = np.stack(grid, axis=-1).reshape(resolution[0], resolution[1], -1)
    grid = grid[None].astype(np.float32)
    return jnp.asarray(np.concatenate([grid, 1.0 - grid], axis=-1))  # (1,H,W,4)


# ------------------------------ Pallas kernel --------------------------------
def _soft_pos_embed_kernel(x_ref, g_ref, w_ref, b_ref, o_ref):
    # x_ref: (B, R, C)  inputs (lane-dense repack: C = 128)
    # g_ref: (R, K)     constant positional grid, repacked to match
    # w_ref: (K, C)     block-diagonal Linear weight (matmul layout)
    # b_ref: (1, C)     Linear bias, tiled to match
    emb = jnp.dot(g_ref[...], w_ref[...],
                  preferred_element_type=jnp.float32) + b_ref[...]   # (R, C) f32
    # Single full-lane VPU add, broadcast over the batch axis in-kernel.
    o_ref[...] = (x_ref[...] + emb[None]).astype(o_ref.dtype)


def soft_position_embed(inputs, grid, w, b):
    """inputs: (B, H, W, D); grid: (1, H, W, 4); w: (4, D) (= torch weight.T);
    b: (D,).  Returns inputs + Linear(grid), shape (B, H, W, D)."""
    B, H, W, D = inputs.shape
    HW = H * W

    if LANE % D == 0 and (HW * D) % LANE == 0:
        # Lane-dense repack: pack g = 128/D spatial positions per 128-lane row.
        g = LANE // D                      # positions per lane row (4 here)
        R = (HW * D) // LANE               # rows (64 here)
        x = inputs.reshape(B, R, LANE)                          # free, row-major
        gg = grid.reshape(HW, 4).reshape(R, 4 * g)              # (64, 16)
        ww = jnp.kron(jnp.eye(g, dtype=w.dtype), w)             # (16, 128) block-diag
        bb = jnp.tile(b, g).reshape(1, LANE)                    # (1, 128)
    else:
        # Fallback: natural channel-last layout (same kernel body).
        x = inputs.reshape(B, HW, D)
        gg = grid.reshape(HW, 4)
        ww = w
        bb = b.reshape(1, D)

    out = pl.pallas_call(
        _soft_pos_embed_kernel,
        out_shape=jax.ShapeDtypeStruct(x.shape, inputs.dtype),
        # Grid-less call: one step, full (tiny) working set resident in VMEM.
        in_specs=[
            pl.BlockSpec(x.shape, lambda: (0, 0, 0)),    # inputs, full block
            pl.BlockSpec(gg.shape, lambda: (0, 0)),      # constant grid
            pl.BlockSpec(ww.shape, lambda: (0, 0)),      # weight
            pl.BlockSpec(bb.shape, lambda: (0, 0)),      # bias
        ],
        out_specs=pl.BlockSpec(x.shape, lambda: (0, 0, 0)),
        # Output reuses the input buffer when the caller donates `inputs`.
        input_output_aliases={0: 0},
    )(x, gg, ww, bb)
    return out.reshape(B, H, W, D)


# ------------------------------ parameter init -------------------------------
def init_params(key):
    kw, kb = jax.random.split(key, 2)
    # nn.Linear(4, HID) stores weight as (HID, 4); we keep the matmul layout
    # (4, HID) == weight.T, which the kernel consumes directly.
    w = jax.random.normal(kw, (4, HID), jnp.float32) / np.sqrt(4.0)
    b = jax.random.normal(kb, (HID,), jnp.float32) * 0.01
    return {'w': w, 'b': b}


# ----------------------------------- main ------------------------------------
if __name__ == "__main__":
    root = jax.random.PRNGKey(0)
    k_params, k_img = jax.random.split(root, 2)

    params = init_params(k_params)
    H, W = RESOLUTION
    inputs = jax.random.normal(k_img, (BATCH, H, W, HID), jnp.float32)
    grid = build_grid(RESOLUTION)                                # (1, H, W, 4)

    fwd = jax.jit(soft_position_embed)
    out = fwd(inputs, grid, params['w'], params['b'])
    out = jax.block_until_ready(out)

    # Reference check (pure JAX) — same math as the PyTorch forward.
    emb_ref = grid.reshape(H * W, 4) @ params['w'] + params['b']
    ref = inputs + emb_ref.reshape(1, H, W, HID)

    assert out.shape == (BATCH, H, W, HID)
    assert out.dtype == inputs.dtype
    assert bool(jnp.all(jnp.isfinite(out)))
    np.testing.assert_allclose(np.asarray(out), np.asarray(ref), rtol=1e-5, atol=1e-5)
    print("KERNEL_OK")
</pallas_src>

<mosaic_0001>
module attributes {stable_mosaic.version = 11 : i64} {
  func.func @_soft_pos_embed_kernel(%arg0: memref<2x64x128xf32, #tpu.memory_space<vmem>>, %arg1: memref<64x16xf32, #tpu.memory_space<vmem>>, %arg2: memref<16x128xf32, #tpu.memory_space<vmem>>, %arg3: memref<1x128xf32, #tpu.memory_space<vmem>>, %arg4: memref<2x64x128xf32, #tpu.memory_space<vmem>>) attributes {dimension_semantics = [], scalar_prefetch = 0 : i64, scratch_operands = 0 : i64, tpu.core_type = #tpu.core_type<tc>} {
    %c0 = arith.constant 0 : index
    %c0_0 = arith.constant 0 : index
    %0 = vector.load %arg1[%c0, %c0_0] : memref<64x16xf32, #tpu.memory_space<vmem>>, vector<64x16xf32>
    %c0_1 = arith.constant 0 : index
    %c0_2 = arith.constant 0 : index
    %1 = vector.load %arg2[%c0_1, %c0_2] : memref<16x128xf32, #tpu.memory_space<vmem>>, vector<16x128xf32>
    %cst = arith.constant dense<0.000000e+00> : vector<64x128xf32>
    %2 = tpu.matmul %0, %1, %cst {dimension_numbers = #tpu.dot_dimension_numbers<[1], [0], [0], [1], [0, 0, 1, 1], [], []>} : vector<64x16xf32>, vector<16x128xf32>, vector<64x128xf32> -> vector<64x128xf32>
    %c0_3 = arith.constant 0 : index
    %c0_4 = arith.constant 0 : index
    %3 = vector.load %arg3[%c0_3, %c0_4] : memref<1x128xf32, #tpu.memory_space<vmem>>, vector<1x128xf32>
    %4 = vector.broadcast %3 : vector<1x128xf32> to vector<64x128xf32>
    %5 = arith.addf %2, %4 : vector<64x128xf32>
    %c0_5 = arith.constant 0 : index
    %c0_6 = arith.constant 0 : index
    %c0_7 = arith.constant 0 : index
    %6 = vector.load %arg0[%c0_5, %c0_6, %c0_7] : memref<2x64x128xf32, #tpu.memory_space<vmem>>, vector<2x64x128xf32>
    %7 = vector.shape_cast %5 : vector<64x128xf32> to vector<1x64x128xf32>
    %8 = vector.broadcast %7 : vector<1x64x128xf32> to vector<2x64x128xf32>
    %9 = arith.addf %6, %8 : vector<2x64x128xf32>
    %c0_8 = arith.constant 0 : index
    %c0_9 = arith.constant 0 : index
    %c0_10 = arith.constant 0 : index
    %10 = vector.load %arg4[%c0_8, %c0_9, %c0_10] : memref<2x64x128xf32, #tpu.memory_space<vmem>>, vector<2x64x128xf32>
    tpu.vector_store %arg4[%c0_8, %c0_9, %c0_10], %9 {strides = array<i32>} : memref<2x64x128xf32, #tpu.memory_space<vmem>>, vector<2x64x128xf32>,
    return
  }
}

</mosaic_0001>

<bundles_post_ra>
// kernel: tile.8
= control target key start
LH: loop header
LB: loop body
LE: loop exit
PB: predicated region body
PF: predicated region fallthrough
CT: control target
= control target key end

     0   :  { %s22_s0 = inlined_call_operand.vmem [shape: f32[32], index: 0, kind: input, shape index: {}]   ;;  %s23_s1 = inlined_call_operand.vmem [shape: f32[4,32], index: 1, kind: output, shape index: {}]  }
   0x1   :  { %v4_v0 = vld [vmem:[%s22_s0] ss:$0 sm:$0xff] }
   0x2   :  { %5 = vst [vmem:[%s23_s1] sm:$0xf] %v4_v0 }

// kernel: tile.9
= control target key start
LH: loop header
LB: loop body
LE: loop exit
PB: predicated region body
PF: predicated region fallthrough
CT: control target
= control target key end

     0   :  { %vm7_vm0 = vcmask 261120   ;;  %s37_s8 = smov 32   ;;  %s38_s9 = smov 64   ;;  %vm13_vm1 = vcmask 1048320   ;;  %vm19_vm2 = vcmask 785920   ;;  %vm25_vm3 = vcmask 523520   ;;  %s55_s0 = inlined_call_operand.vmem [shape: f32[4,32], index: 0, kind: input, shape index: {}]   ;;  %s56_s1 = inlined_call_operand.vmem [shape: f32[1,128], index: 1, kind: output, shape index: {}]  }
   0x1   :  { %v4_v0 = vld [vmem:[%s55_s0] sm:$0xf]  ;;  %s36_s0 = smov 96  }
   0x2   :  { %5 = vst [vmem:[#allocation1] sm:$0xf] %v4_v0 }
   0x9   :  { %v10_v1 = vld [vmem:[#allocation1 + $0x3] sm:$0x1]   ;;  %v22_v2 = vld [vmem:[#allocation1 + $0x1] sm:$0x1]   ;;  %v6_v3 = vld [vmem:[#allocation1] sm:$0x1]  }
   0xa   :  { %11 = vrot.lane.b32.xlu0 %v10_v1, %s36_s0  ;;  %23 = vrot.lane.b32.xlu1 %v22_v2, %s37_s8  ;;  %v16_v4 = vld [vmem:[#allocation1 + $0x2] sm:$0x1]   ;;  %8 = vst.msk [vmem:[#allocation0] sm:$0x1] %vm7_vm0, %v6_v3  }
   0xe   :  { %17 = vrot.lane.b32.xlu0 %v16_v4, %s38_s9 }
  0x7c   :  { %v12_v5 = vpop.permute.xlu0 %11   ;;  %v24_v6 = vpop.permute.xlu1 %23  }
  0x7d   :  { %14 = vst.msk [vmem:[#allocation0] sm:$0x1] %vm13_vm1, %v12_v5  }
  0x80   :  { %v18_v7 = vpop.permute.xlu0 %17  }
  0x81   :  { %20 = vst.msk [vmem:[#allocation0] sm:$0x1] %vm19_vm2, %v18_v7  }
  0x82   :  { %26 = vst.msk [vmem:[#allocation0] sm:$0x1] %vm25_vm3, %v24_v6  }
  0x89   :  { %v30_v8 = vld [vmem:[#allocation0] sm:$0x1] }
  0x8a   :  { %32 = vst [vmem:[%s56_s1] sm:$0x1] %v30_v8 }

// kernel: soft_position_embed.1
= control target key start
LH: loop header
LB: loop body
LE: loop exit
PB: predicated region body
PF: predicated region fallthrough
CT: control target
= control target key end

     0   :  { %vm34_vm0 = vcmask 130048   ;;  %s419_s2 = inlined_call_operand.vmem [shape: f32[16,128], index: 2, kind: input, shape index: {}]   ;;  %s420_s1 = inlined_call_operand.vmem [shape: f32[64,16], index: 1, kind: input, shape index: {}]   ;;  %s421_s3 = inlined_call_operand.vmem [shape: f32[1,128], index: 3, kind: input, shape index: {}]   ;;  %s422_s0 = inlined_call_operand.vmem [shape: f32[2,64,128], index: 0, kind: input, shape index: {}, may-alias: {0,4}]   ;;  %s423_s4 = inlined_call_operand.vmem [shape: f32[2,64,128], index: 4, kind: output, shape index: {}, may-alias: {0,4}]  }
   0x1   :  { %v25_v0 = vld [vmem:[%s419_s2] sm:$0xff]  ;;  %v26_v1 = vld [vmem:[%s419_s2 + $0x8] sm:$0xff]  ;;  %v19_v7 = vld [vmem:[%s420_s1 + $0x10] sm:$0xff] }
   0x2   :  { %v17_v2 = vld [vmem:[%s420_s1] sm:$0xff]  ;;  %v251_v3 = vpack.c.bf16 %v26_v1, %v25_v0  ;;  %v18_v5 = vld [vmem:[%s420_s1 + $0x8] sm:$0xff]  ;;  %v23_v8 = vld [vmem:[%s420_s1 + $0x30] sm:$0xff] }
   0x3   :  { %239 = vmatprep.mubr.msk.f32.mxu0 %vm34_vm0, %v17_v2  ;;  %v21_v4 = vld [vmem:[%s420_s1 + $0x20] sm:$0xff]  ;;  %v22_v6 = vld [vmem:[%s420_s1 + $0x28] sm:$0xff]  ;;  %v20_v9 = vld [vmem:[%s420_s1 + $0x18] sm:$0xff] }
   0x4   :  { %245 = vmatprep.mubr.msk.f32.mxu1 %vm34_vm0, %v21_v4  ;;  %252 = vmatprep.subr.bf16.mxu0 %v251_v3  ;;  %v24_v10 = vld [vmem:[%s420_s1 + $0x38] sm:$0xff]  ;;  %v216_v11 = vld [vmem:[%s421_s3] ss:$0 sm:$0xff]  ;;  %v165_v12 = vld [vmem:[%s422_s0 + $0x8] sm:$0xff] }
   0x5   :  { %255 = vmatprep.subr.bf16.mxu1 %v251_v3  ;;  %254 = vmatpush3.bf16.msra.mxu0 %v251_v3  ;;  %v173_v13 = vld [vmem:[%s422_s0 + $0x48] sm:$0xff]  ;;  %v164_v18 = vld [vmem:[%s422_s0] sm:$0xff]  ;;  %v167_v32 = vld [vmem:[%s422_s0 + $0x18] sm:$0xff] }
   0x6   :  { %256 = vmatpush3.bf16.msra.mxu1 %v251_v3  ;;  %v169_v16 = vld [vmem:[%s422_s0 + $0x28] sm:$0xff]  ;;  %v172_v22 = vld [vmem:[%s422_s0 + $0x40] sm:$0xff]  ;;  %v175_v33 = vld [vmem:[%s422_s0 + $0x58] sm:$0xff] }
   0x7   :  { %v177_v17 = vld [vmem:[%s422_s0 + $0x68] sm:$0xff]  ;;  %v168_v24 = vld [vmem:[%s422_s0 + $0x20] sm:$0xff]  ;;  %v171_v40 = vld [vmem:[%s422_s0 + $0x38] sm:$0xff] }
   0x8   :  { %240 = vmatmul.mubr.msk.f32.vlgmr.msra.gmra.mrb[0].mxu0 %vm34_vm0, %v18_v5  ;;  %v176_v25 = vld [vmem:[%s422_s0 + $0x60] sm:$0xff]  ;;  %v179_v41 = vld [vmem:[%s422_s0 + $0x78] sm:$0xff]  ;;  %v166_v42 = vld [vmem:[%s422_s0 + $0x10] sm:$0xff] }
   0x9   :  { %246 = vmatmul.mubr.msk.f32.vlgmr.msra.gmra.mrb[0].mxu1 %vm34_vm0, %v22_v6  ;;  %242 = vmatprep.mubr.msk.f32.mxu0 %vm34_vm0, %v19_v7 }
   0xa   :  { %248 = vmatprep.mubr.msk.f32.mxu1 %vm34_vm0, %v23_v8 }
   0xc   :  { %243 = vmatmul.mubr.msk.f32.gmra.mrb[2].mxu0 %vm34_vm0, %v20_v9 }
   0xd   :  { %249 = vmatmul.mubr.msk.f32.gmra.mrb[2].mxu1 %vm34_vm0, %v24_v10 }
  0xdb   :  { %v241_v14 = vpop.f32.mrb[0].mxu0 }
  0xdc   :  { %v247_v15 = vpop.f32.mrb[0].mxu1  ;;  %v131_v19 = vadd.f32 %v241_v14, %v216_v11  ;;  %v125_v21 = vpop.f32.mrb[1].mxu0 }
  0xdd   :  { %v151_v20 = vadd.f32 %v247_v15, %v216_v11  ;;  %v145_v23 = vpop.f32.mrb[1].mxu1  ;;  %v126_v26 = vadd.f32 %v216_v11, %v125_v21 }
  0xde   :  { %v146_v27 = vadd.f32 %v216_v11, %v145_v23  ;;  %v181_v28 = vadd.f32 %v165_v12, %v131_v19  ;;  %v189_v29 = vadd.f32 %v173_v13, %v131_v19 }
  0xdf   :  { %v185_v30 = vadd.f32 %v169_v16, %v151_v20  ;;  %v193_v31 = vadd.f32 %v177_v17, %v151_v20  ;;  %v180_v34 = vadd.f32 %v164_v18, %v126_v26  ;;  %v188_v35 = vadd.f32 %v172_v22, %v126_v26  ;;  %v244_v38 = vpop.f32.mrb[2].mxu0 }
  0xe0   :  { %v184_v36 = vadd.f32 %v168_v24, %v146_v27  ;;  %v192_v37 = vadd.f32 %v176_v25, %v146_v27  ;;  %v250_v39 = vpop.f32.mrb[2].mxu1  ;;  %197 = vst [vmem:[%s423_s4 + $0x8] sm:$0xff] %v181_v28  ;;  %205 = vst [vmem:[%s423_s4 + $0x48] sm:$0xff] %v189_v29  ;;  %v141_v43 = vadd.f32 %v244_v38, %v216_v11  ;;  %v135_v45 = vpop.f32.mrb[3].mxu0 }
  0xe1   :  { %201 = vst [vmem:[%s423_s4 + $0x28] sm:$0xff] %v185_v30  ;;  %209 = vst [vmem:[%s423_s4 + $0x68] sm:$0xff] %v193_v31  ;;  %v161_v44 = vadd.f32 %v250_v39, %v216_v11  ;;  %v155_v47 = vpop.f32.mrb[3].mxu1  ;;  %v136_v50 = vadd.f32 %v216_v11, %v135_v45 }
  0xe2   :  { %v156_v51 = vadd.f32 %v216_v11, %v155_v47  ;;  %v183_v52 = vadd.f32 %v167_v32, %v141_v43  ;;  %v191_v53 = vadd.f32 %v175_v33, %v141_v43 }
  0xe3   :  { %v187_v54 = vadd.f32 %v171_v40, %v161_v44  ;;  %v195_v55 = vadd.f32 %v179_v41, %v161_v44  ;;  %v182_v56 = vadd.f32 %v166_v42, %v136_v50 }
  0xe8   :  { %v174_v46 = vld [vmem:[%s422_s0 + $0x50] sm:$0xff] }
  0xe9   :  { %v170_v48 = vld [vmem:[%s422_s0 + $0x30] sm:$0xff]  ;;  %v190_v57 = vadd.f32 %v174_v46, %v136_v50 }
  0xea   :  { %v178_v49 = vld [vmem:[%s422_s0 + $0x70] sm:$0xff]  ;;  %v186_v58 = vadd.f32 %v170_v48, %v156_v51 }
  0xeb   :  { %196 = vst [vmem:[%s423_s4] sm:$0xff] %v180_v34  ;;  %204 = vst [vmem:[%s423_s4 + $0x40] sm:$0xff] %v188_v35  ;;  %v194_v59 = vadd.f32 %v178_v49, %v156_v51 }
  0xec   :  { %200 = vst [vmem:[%s423_s4 + $0x20] sm:$0xff] %v184_v36  ;;  %208 = vst [vmem:[%s423_s4 + $0x60] sm:$0xff] %v192_v37 }
  0xed   :  { %199 = vst [vmem:[%s423_s4 + $0x18] sm:$0xff] %v183_v52  ;;  %207 = vst [vmem:[%s423_s4 + $0x58] sm:$0xff] %v191_v53 }
  0xee   :  { %203 = vst [vmem:[%s423_s4 + $0x38] sm:$0xff] %v187_v54  ;;  %211 = vst [vmem:[%s423_s4 + $0x78] sm:$0xff] %v195_v55 }
  0xef   :  { %198 = vst [vmem:[%s423_s4 + $0x10] sm:$0xff] %v182_v56  ;;  %206 = vst [vmem:[%s423_s4 + $0x50] sm:$0xff] %v190_v57 }
  0xf0   :  { %202 = vst [vmem:[%s423_s4 + $0x30] sm:$0xff] %v186_v58  ;;  %210 = vst [vmem:[%s423_s4 + $0x70] sm:$0xff] %v194_v59 }

</bundles_post_ra>
